<compile_context>
chip_gen: v6e
topology: v6e:2x2x1
jax: 0.10.0
libtpu: 0.0.40
codegen_flags: <defaults>
</compile_context>

<pallas_src>
import functools

import jax
import jax.numpy as jnp
from jax.experimental import pallas as pl
from jax.experimental.pallas import tpu as pltpu


def _round_up(x, m):
    return (x + m - 1) // m * m


def _rgcn_kernel(gid_ref, h_ref, w_ref, dst_ref, out_ref, *, apply_relu):
    # gid_ref: scalar-prefetch (SMEM) per-tile relation id -- used only by the
    # weight index_map, unused in the body.
    del gid_ref
    n_tile = out_ref.shape[0]
    t = pl.program_id(1)

    @pl.when(t == 0)
    def _():
        out_ref[...] = jnp.zeros_like(out_ref)

    # Relation-homogeneous edge tile: (EDGE_TILE, D_in) @ (D_in, D_out) on MXU.
    # norm is pre-folded into the h rows, so no per-edge scaling remains here.
    msg = jnp.dot(h_ref[...], w_ref[0],
                  preferred_element_type=jnp.float32)            # (Et, D_out) f32

    # Build the scatter one-hot tile in-kernel from lane-major dst ids.
    dst_ids = dst_ref[0]                                         # (1, Et) int32
    row0 = pl.program_id(0) * n_tile
    node_ids = jax.lax.broadcasted_iota(
        jnp.int32, (n_tile, dst_ids.shape[-1]), 0) + row0        # (Nt, Et)
    onehot = (node_ids == dst_ids).astype(jnp.bfloat16)          # exact in bf16

    # Scatter-sum into the resident output block: (Nt, Et) @ (Et, D_out).
    out_ref[...] += jnp.dot(onehot, msg.astype(jnp.bfloat16),
                            preferred_element_type=jnp.float32)

    if apply_relu:
        @pl.when(t == pl.num_programs(1) - 1)
        def _():
            out_ref[...] = jnp.maximum(out_ref[...], 0.0)


def rgcn_layer(h, weight, src, dst, rel_type, norm, *, activation="relu",
               edge_tile=128, node_tile_max=256):
    """R-GCN layer forward (is_input=False branch)."""
    N, D_in = h.shape
    R, _, D_out = weight.shape
    E = src.shape[0]

    # ---- glue (plain JAX): group edges by relation, pad groups to edge_tile ---
    order = jnp.argsort(rel_type)
    rel_s = rel_type[order].astype(jnp.int32)
    src_s = src[order]
    dst_s = dst[order].astype(jnp.int32)
    norm_s = norm[order].astype(jnp.float32)

    counts = jnp.bincount(rel_s, length=R).astype(jnp.int32)          # (R,)
    tiles_per_rel = (counts + edge_tile - 1) // edge_tile
    pad_counts = (tiles_per_rel * edge_tile).astype(jnp.int32)
    pad_ends = jnp.cumsum(pad_counts).astype(jnp.int32)
    pad_starts = pad_ends - pad_counts
    unpad_starts = (jnp.cumsum(counts) - counts).astype(jnp.int32)

    rank = jnp.arange(E, dtype=jnp.int32) - unpad_starts[rel_s]
    pos = pad_starts[rel_s] + rank            # position in padded sorted layout

    # Static upper bound on the number of relation-homogeneous edge tiles.
    num_tiles = (E + edge_tile - 1) // edge_tile + R
    e_pad = num_tiles * edge_tile

    # Fold norm into the gathered source rows: (h_src @ W) * norm == (h_src*norm) @ W.
    h_rows = (h[src_s].astype(jnp.float32) * norm_s[:, None]).astype(jnp.bfloat16)
    h_pad = jnp.zeros((e_pad, D_in), jnp.bfloat16).at[pos].set(h_rows)
    dst_pad = jnp.full((e_pad,), -1, jnp.int32).at[pos].set(dst_s)
    dst_pad = dst_pad.reshape(num_tiles, 1, edge_tile)                # lane-major ids

    # Per-tile relation id (scalar prefetch -> SMEM, drives the W index_map).
    tile_start = jnp.arange(num_tiles, dtype=jnp.int32) * edge_tile
    group_id = jnp.clip(jnp.searchsorted(pad_ends, tile_start, side="right"),
                        0, R - 1).astype(jnp.int32)

    # Node tiling: parallel axis (v7x megacore) and bounded VMEM footprint.
    n_tile = _round_up(N, 8) if N <= node_tile_max else node_tile_max
    n_pad = _round_up(N, n_tile)
    n_node_tiles = n_pad // n_tile

    kernel = functools.partial(_rgcn_kernel,
                               apply_relu=(activation == "relu"))

    out = pl.pallas_call(
        kernel,
        out_shape=jax.ShapeDtypeStruct((n_pad, D_out), jnp.float32),
        grid_spec=pltpu.PrefetchScalarGridSpec(
            num_scalar_prefetch=1,
            grid=(n_node_tiles, num_tiles),
            in_specs=[
                pl.BlockSpec((edge_tile, D_in), lambda n, t, gid: (t, 0)),
                pl.BlockSpec((1, D_in, D_out), lambda n, t, gid: (gid[t], 0, 0)),
                pl.BlockSpec((1, 1, edge_tile), lambda n, t, gid: (t, 0, 0)),
            ],
            out_specs=pl.BlockSpec((n_tile, D_out), lambda n, t, gid: (n, 0)),
        ),
        compiler_params=pltpu.CompilerParams(
            dimension_semantics=("parallel", "arbitrary")),
    )(group_id, h_pad, weight.astype(jnp.bfloat16), dst_pad)

    return out[:N]


def rgcn_ref(h, weight, src, dst, rel_type, norm, activation="relu"):
    """Pure-JAX reference matching the PyTorch forward (f32)."""
    msg = jnp.einsum("ed,edo->eo", h[src], weight[rel_type]) * norm[:, None]
    out = jnp.zeros((h.shape[0], weight.shape[2]), jnp.float32).at[dst].add(msg)
    if activation == "relu":
        out = jax.nn.relu(out)
    return out


def xavier_uniform(key, shape):
    # torch.nn.init.xavier_uniform_ for a (R, D_in, D_out) tensor:
    # fan_in = D_in * D_out, fan_out = R * D_out, bound = sqrt(6/(fi+fo)).
    r, d_in, d_out = shape
    fan_in = d_in * d_out
    fan_out = r * d_out
    bound = (6.0 / (fan_in + fan_out)) ** 0.5
    return jax.random.uniform(key, shape, jnp.float32, -bound, bound)


if __name__ == "__main__":
    key = jax.random.PRNGKey(0)
    k_w, k_h, k_src, k_dst, k_rel, k_norm = jax.random.split(key, 6)

    # Small synthetic graph consistent with the module's shapes.
    input_dim, output_dim, rel_num = 64, 128, 3
    num_nodes, num_edges = 32, 256

    weight = xavier_uniform(k_w, (rel_num, input_dim, output_dim))
    h = jax.random.normal(k_h, (num_nodes, input_dim), jnp.float32)
    src = jax.random.randint(k_src, (num_edges,), 0, num_nodes)
    dst = jax.random.randint(k_dst, (num_edges,), 0, num_nodes)
    rel_type = jax.random.randint(k_rel, (num_edges,), 0, rel_num)
    norm = jax.random.uniform(k_norm, (num_edges,), jnp.float32, 0.1, 1.0)

    out = rgcn_layer(h, weight, src, dst, rel_type, norm, activation="relu")
    out = jax.block_until_ready(out)

    ref = rgcn_ref(h, weight, src, dst, rel_type, norm, activation="relu")
    assert out.shape == (num_nodes, output_dim)
    # bf16 MXU inputs (f32 accumulation) -> loosened tolerance vs. f32 reference.
    max_err = jnp.max(jnp.abs(out - ref))
    assert jnp.allclose(out, ref, atol=3e-2, rtol=3e-2), f"max abs err {max_err}"

    print("KERNEL_OK")
</pallas_src>

<mosaic_0001>
module attributes {stable_mosaic.version = 11 : i64} {
  func.func @_rgcn_kernel(%arg0: i32, %arg1: i32, %arg2: memref<5xi32, #tpu.memory_space<smem>>, %arg3: memref<128x64xbf16, #tpu.memory_space<vmem>>, %arg4: memref<1x64x128xbf16, #tpu.memory_space<vmem>>, %arg5: memref<1x1x128xi32, #tpu.memory_space<vmem>>, %arg6: memref<32x128xf32, #tpu.memory_space<vmem>>) attributes {dimension_semantics = [#tpu.dimension_semantics<parallel>, #tpu.dimension_semantics<arbitrary>], iteration_bounds = array<i64: 1, 5>, scalar_prefetch = 1 : i64, scratch_operands = 0 : i64, tpu.core_type = #tpu.core_type<tc>, window_params = [{transform_indices = @transform_0, window_bounds = array<i64: 128, 64>}, {transform_indices = @transform_1, window_bounds = array<i64: 1, 64, 128>}, {transform_indices = @transform_2, window_bounds = array<i64: 1, 1, 128>}, {transform_indices = @transform_3, window_bounds = array<i64: 32, 128>}]} {
    %c0_i32 = arith.constant 0 : i32
    %0 = arith.cmpi eq, %arg1, %c0_i32 : i32
    %1 = arith.extui %0 : i1 to i32
    %c0_i32_0 = arith.constant 0 : i32
    %2 = arith.cmpi ne, %1, %c0_i32_0 : i32
    scf.if %2 {
      %cst_14 = arith.constant 0.000000e+00 : f32
      %26 = vector.broadcast %cst_14 : f32 to vector<32x128xf32>
      %c0_15 = arith.constant 0 : index
      %c0_16 = arith.constant 0 : index
      %27 = vector.load %arg6[%c0_15, %c0_16] : memref<32x128xf32, #tpu.memory_space<vmem>>, vector<32x128xf32>
      tpu.vector_store %arg6[%c0_15, %c0_16], %26 {strides = array<i32>} : memref<32x128xf32, #tpu.memory_space<vmem>>, vector<32x128xf32>,
    } else {
    }
    %c0 = arith.constant 0 : index
    %c0_1 = arith.constant 0 : index
    %3 = vector.load %arg3[%c0, %c0_1] : memref<128x64xbf16, #tpu.memory_space<vmem>>, vector<128x64xbf16>
    %c0_2 = arith.constant 0 : index
    %c0_3 = arith.constant 0 : index
    %c0_4 = arith.constant 0 : index
    %4 = vector.load %arg4[%c0_2, %c0_3, %c0_4] : memref<1x64x128xbf16, #tpu.memory_space<vmem>>, vector<1x64x128xbf16>
    %5 = vector.shape_cast %4 : vector<1x64x128xbf16> to vector<64x128xbf16>
    %cst = arith.constant dense<0.000000e+00> : vector<128x128xf32>
    %6 = tpu.matmul %3, %5, %cst {dimension_numbers = #tpu.dot_dimension_numbers<[1], [0], [0], [1], [0, 0, 1, 1], [], []>} : vector<128x64xbf16>, vector<64x128xbf16>, vector<128x128xf32> -> vector<128x128xf32>
    %c0_5 = arith.constant 0 : index
    %c0_6 = arith.constant 0 : index
    %c0_7 = arith.constant 0 : index
    %7 = vector.load %arg5[%c0_5, %c0_6, %c0_7] : memref<1x1x128xi32, #tpu.memory_space<vmem>>, vector<1x1x128xi32>
    %8 = vector.shape_cast %7 : vector<1x1x128xi32> to vector<1x128xi32>
    %c32_i32 = arith.constant 32 : i32
    %9 = arith.muli %arg0, %c32_i32 : i32
    %10 = tpu.iota {dimensions = array<i32: 0>} : vector<32x128xi32>
    %11 = vector.broadcast %9 : i32 to vector<32x128xi32>
    %12 = arith.addi %10, %11 : vector<32x128xi32>
    %13 = vector.broadcast %8 : vector<1x128xi32> to vector<32x128xi32>
    %14 = arith.cmpi eq, %12, %13 : vector<32x128xi32>
    %15 = arith.extui %14 : vector<32x128xi1> to vector<32x128xi32>
    %16 = arith.sitofp %15 : vector<32x128xi32> to vector<32x128xf32>
    %17 = arith.truncf %16 : vector<32x128xf32> to vector<32x128xbf16>
    %c0_8 = arith.constant 0 : index
    %c0_9 = arith.constant 0 : index
    %18 = vector.load %arg6[%c0_8, %c0_9] : memref<32x128xf32, #tpu.memory_space<vmem>>, vector<32x128xf32>
    %19 = arith.truncf %6 : vector<128x128xf32> to vector<128x128xbf16>
    %cst_10 = arith.constant dense<0.000000e+00> : vector<32x128xf32>
    %20 = tpu.matmul %17, %19, %cst_10 {dimension_numbers = #tpu.dot_dimension_numbers<[1], [0], [0], [1], [0, 0, 1, 1], [], []>} : vector<32x128xbf16>, vector<128x128xbf16>, vector<32x128xf32> -> vector<32x128xf32>
    %21 = arith.addf %18, %20 : vector<32x128xf32>
    %c0_11 = arith.constant 0 : index
    %c0_12 = arith.constant 0 : index
    %22 = vector.load %arg6[%c0_11, %c0_12] : memref<32x128xf32, #tpu.memory_space<vmem>>, vector<32x128xf32>
    tpu.vector_store %arg6[%c0_11, %c0_12], %21 {strides = array<i32>} : memref<32x128xf32, #tpu.memory_space<vmem>>, vector<32x128xf32>,
    %c4_i32 = arith.constant 4 : i32
    %23 = arith.cmpi eq, %arg1, %c4_i32 : i32
    %24 = arith.extui %23 : i1 to i32
    %c0_i32_13 = arith.constant 0 : i32
    %25 = arith.cmpi ne, %24, %c0_i32_13 : i32
    scf.if %25 {
      %c0_14 = arith.constant 0 : index
      %c0_15 = arith.constant 0 : index
      %26 = vector.load %arg6[%c0_14, %c0_15] : memref<32x128xf32, #tpu.memory_space<vmem>>, vector<32x128xf32>
      %cst_16 = arith.constant 0.000000e+00 : f32
      %27 = vector.broadcast %cst_16 : f32 to vector<32x128xf32>
      %28 = arith.maximumf %26, %27 : vector<32x128xf32>
      %c0_17 = arith.constant 0 : index
      %c0_18 = arith.constant 0 : index
      %29 = vector.load %arg6[%c0_17, %c0_18] : memref<32x128xf32, #tpu.memory_space<vmem>>, vector<32x128xf32>
      tpu.vector_store %arg6[%c0_17, %c0_18], %28 {strides = array<i32>} : memref<32x128xf32, #tpu.memory_space<vmem>>, vector<32x128xf32>,
    } else {
    }
    return
  }
  func.func @transform_0(%arg0: i32, %arg1: i32, %arg2: memref<5xi32, #tpu.memory_space<smem>>) -> (i32, i32) {
    %c0_i32 = arith.constant 0 : i32
    %c0_i32_0 = arith.constant 0 : i32
    return %arg1, %c0_i32 : i32, i32
  }
  func.func @transform_1(%arg0: i32, %arg1: i32, %arg2: memref<5xi32, #tpu.memory_space<smem>>) -> (i32, i32, i32) {
    %0 = arith.index_cast %arg1 : i32 to index
    %1 = memref.load %arg2[%0] : memref<5xi32, #tpu.memory_space<smem>>
    %c0_i32 = arith.constant 0 : i32
    %c0_i32_0 = arith.constant 0 : i32
    %c0_i32_1 = arith.constant 0 : i32
    return %1, %c0_i32, %c0_i32_0 : i32, i32, i32
  }
  func.func @transform_2(%arg0: i32, %arg1: i32, %arg2: memref<5xi32, #tpu.memory_space<smem>>) -> (i32, i32, i32) {
    %c0_i32 = arith.constant 0 : i32
    %c0_i32_0 = arith.constant 0 : i32
    %c0_i32_1 = arith.constant 0 : i32
    return %arg1, %c0_i32, %c0_i32_0 : i32, i32, i32
  }
  func.func @transform_3(%arg0: i32, %arg1: i32, %arg2: memref<5xi32, #tpu.memory_space<smem>>) -> (i32, i32) {
    %c0_i32 = arith.constant 0 : i32
    %c0_i32_0 = arith.constant 0 : i32
    return %arg0, %c0_i32 : i32, i32
  }
}

</mosaic_0001>

<bundles_post_ra>
// kernel: tpu_custom_call.1
= control target key start
LH: loop header
LB: loop body
LE: loop exit
PB: predicated region body
PF: predicated region fallthrough
CT: control target
= control target key end

     0   :  { %s994_s0 = inlined_call_operand.vmem [shape: s32[5], index: 0, kind: input, shape index: {}]   ;;  %s995_s1 = inlined_call_operand.vmem [shape: bf16[640,64], index: 1, kind: input, shape index: {}]   ;;  %s996_s2 = inlined_call_operand.vmem [shape: bf16[3,64,128], index: 2, kind: input, shape index: {}]   ;;  %s997_s3 = inlined_call_operand.vmem [shape: s32[5,1,128], index: 3, kind: input, shape index: {}]   ;;  %s998_s4 = inlined_call_operand.hbm [shape: f32[32,128], index: 4, kind: output, shape index: {}]  }
   0x1   :  { %s9_s17 = sshll.u32 %s994_s0, 4  ;;  %s10_s17 = int_to_ptr.vmem [resolvable:$true] %s9_s17 }
   0x2   :  { %s800_s18 = scalar_lea.vmem %s10_s17, 16  ;;  %p805_p1 = scmp.lt.s32.totalorder %s10_s17, %s10_s17 }
   0x3   :  { %p801_p0 = scmp.ne.s32.totalorder %s10_s17, %s800_s18  ;;  %p806_p2 = scmp.lt.s32.totalorder %s800_s18, %s800_s18 }
   0x5   :  { %p807_p3 = por %p806_p2, %p805_p1 }
   0x7   :  { %p808_p4 = pnand %p807_p3, %p801_p0 }
   0x9   :  { %811 = shalt.err (!%p808_p4)  }
   0xa   :  { %s866_s19 = smov [#allocation3]  }
   0xb   :  { %12 = dma.vmem_to_smem %s10_s17, 16, %s866_s19, [#allocation2] }
   0xc   :  { %848 = dma.done.wait [#allocation2], 16 }
   0xd   :  { %849 = vsyncadd [#allocation2], 4294967280 }
   0xe   :  { %14 = sfence }
   0xf   :  { %15 = vsyncpa [#allocation5], 0  ;;  %s900_s20 = smov 0   ;;  %s902_s21 = smov 0  }
  0x10   :  { %s904_s22 = smov 0  }
  0x11 LB: > { %s642_s0 = sadd.s32 4294967295, %s864_s22   ;;  %s30_s23 = sadd.s32 1, %s860_s21  ;;  %s864_s22 = sphi %s904_s22, %s21_s22   ;;  %s860_s21 = sphi %s902_s21, %s1003_s21   ;;  %s856_s20 = sphi %s900_s20, %s1002_s20  }
  0x12   : > { %p31_p5 = scmp.ge.s32.totalorder %s30_s23, 5  ;;  %p645_p6 = scmp.ge.s32.totalorder %s864_s22, 1 }
  0x13   : > { %p180_p7 = scmp.lt.s32.totalorder %s864_s22, 6 }
  0x14   : > { %s1005_s23 = smov (%p31_p5, %s30_s23), 0 }
  0x15   : > { %p181_p8 = pnand %p645_p6, %p180_p7 }
  0x16   : > { %s646_s24 = sshll.u32 (!%p181_p8), %s856_s20, 4  ;;  %s214_s25 = sld [smem:[#allocation3 + %s856_s20]] (!%p181_p8) }
  0x17   : > { %184 = sbr.rel (%p181_p8) target bundleno = 540 (0x21c), region = 32  ;;  %p209_p9 = scmp.lt.s32.totalorder (!%p181_p8), %s646_s24, 79 }
  0x18   : > { %p221_p10 = scmp.lt.s32.totalorder (!%p181_p8), %s856_s20, 4  ;;  %p650_p12 = scmp.ne.s32.totalorder (!%p181_p8), %s856_s20, 0 }
  0x1c   : > { %s1007_s24 = smov (!%p209_p9, %s646_s24), 79  ;;  %p215_p11 = scmp.lt.s32.totalorder %s214_s25, 2 }
  0x1d   : > { %s925_s26 = scalar_select %p221_p10, %s856_s20, 4 }
  0x1e   : > { %s647_s27 = sshll.u32 %s1007_s24, 2  ;;  %s1009_s25 = smov (!%p215_p11, %s214_s25), 2 }
  0x1f   : > { %s930_s30 = scalar_lea.vmem %s995_s1, %s647_s27  ;;  %s223_s7 = scalar_lea.vmem %s997_s3, %s925_s26 }
  0x20   : > { %s685_s8 = sshll.u32 %s1009_s25, 5  ;;  %229 = sbr.rel (%p650_p12) target bundleno = 40 (0x28), region = 36 }
  0x21   : > { %s219_s11 = scalar_lea.vmem %s996_s2, %s685_s8 }
  0x25   : > { %v867_v0 = vmov 0.0  }
  0x26   : > { %230 = vst [vmem:[#allocation4] sm:$0xff] %v867_v0  ;;  %231 = vst [vmem:[#allocation4 + $0x8] sm:$0xff] %v867_v0 }
  0x27   : > { %232 = vst [vmem:[#allocation4 + $0x10] sm:$0xff] %v867_v0  ;;  %233 = vst [vmem:[#allocation4 + $0x18] sm:$0xff] %v867_v0 }
  0x28 PF: > { %v788_v1 = vld [vmem:[%s219_s11 + $0x18] sm:$0xff]   ;;  %v789_v2 = vld [vmem:[%s219_s11 + $0x10] sm:$0xff]   ;;  %v790_v3 = vld [vmem:[%s219_s11 + $0x8] sm:$0xff]   ;;  %vm322_vm0 = vcmask 523264   ;;  %v446_v13 = vlaneseq  ;;  %v868_v19 = vmov 1.0|1.0  }
  0x29   : > { %708 = vmatprep.subr.bf16.mxu0 %v788_v1  ;;  %v792_v4 = vld [vmem:[%s930_s30] sm:$0xff]   ;;  %v793_v6 = vld [vmem:[%s930_s30 + $0x8] sm:$0xff]   ;;  %v794_v7 = vld [vmem:[%s930_s30 + $0x10] sm:$0xff]   ;;  %p680_p13 = scmp.ne.s32.totalorder %s856_s20, 4 }
  0x2a   : > { %709 = vmatpush3.bf16.msra.mxu0 %v788_v1  ;;  %716 = vmatprep.mubr.msk.bf16.mxu0 %vm322_vm0, %v792_v4  ;;  %v791_v5 = vld [vmem:[%s219_s11] sm:$0xff]   ;;  %v795_v8 = vld [vmem:[%s930_s30 + $0x18] sm:$0xff]   ;;  %v797_v10 = vld [vmem:[%s930_s30 + $0x28] sm:$0xff]   ;;  %v447_v14 = vshrl.u32 %v446_v13, 7 }
  0x2b   : > { %710 = vmatprep.subr.bf16.mxu0 %v789_v2  ;;  %v796_v9 = vld [vmem:[%s930_s30 + $0x20] sm:$0xff]   ;;  %v798_v11 = vld [vmem:[%s930_s30 + $0x30] sm:$0xff]   ;;  %v799_v12 = vld [vmem:[%s930_s30 + $0x38] sm:$0xff]  }
  0x2c   : > { %v448_v15 = vadd.s32 8, %v447_v14  ;;  %v671_v16 = vld [vmem:[%s223_s7] ss:$0 sm:$0xff]  ;;  %v449_v17 = vadd.s32 16, %v447_v14  ;;  %v450_v18 = vadd.s32 24, %v447_v14 }
  0x2d   : > { %vm460_vm1 = vcmp.eq.s32.totalorder %v447_v14, %v671_v16  ;;  %v474_v47 = vld [vmem:[#allocation4] sm:$0xff]  ;;  %v475_v53 = vld [vmem:[#allocation4 + $0x8] sm:$0xff] }
  0x2e   : > { %711 = vmatpush3.bf16.msra.mxu0 %v789_v2  ;;  %vm461_vm2 = vcmp.eq.s32.totalorder %v448_v15, %v671_v16  ;;  %vm462_vm4 = vcmp.eq.s32.totalorder %v449_v17, %v671_v16  ;;  %vm463_vm5 = vcmp.eq.s32.totalorder %v450_v18, %v671_v16  ;;  %v476_v45 = vld [vmem:[#allocation4 + $0x10] sm:$0xff]  ;;  %v477_v50 = vld [vmem:[#allocation4 + $0x18] sm:$0xff] }
  0x2f   : > { %712 = vmatprep.subr.bf16.mxu0 %v790_v3  ;;  %vm676_vm3 = vmpackc.low %vm461_vm2, %vm460_vm1 }
  0x30   : > { %748 = vmatprep.mubr.msk.bf16.mxu1 %vm676_vm3, %v868_v19  ;;  %vm961_vm6 = vmpackc.low %vm463_vm5, %vm462_vm4 }
  0x32   : > { %713 = vmatpush3.bf16.msra.mxu0 %v790_v3 }
  0x33   : > { %714 = vmatprep.subr.bf16.mxu0 %v791_v5 }
  0x36   : > { %715 = vmatpush3.bf16.msra.mxu0 %v791_v5 }
  0x39   : > { %717 = vmatmul.mubr.msk.bf16.vlgmr.msra.gmra.mxu0 %vm322_vm0, %v793_v6 }
  0x3a   : > { %720 = vmatprep.mubr.msk.bf16.mxu0 %vm322_vm0, %v794_v7 }
  0x41   : > { %721 = vmatmul.mubr.msk.bf16.gmra.mxu0 %vm322_vm0, %v795_v8 }
  0x42   : > { %724 = vmatprep.mubr.msk.bf16.mxu0 %vm322_vm0, %v796_v9 }
  0x49   : > { %725 = vmatmul.mubr.msk.bf16.gmra.mxu0 %vm322_vm0, %v797_v10 }
  0x4a   : > { %728 = vmatprep.mubr.msk.bf16.mxu0 %vm322_vm0, %v798_v11 }
  0x51   : > { %729 = vmatmul.mubr.msk.bf16.gmra.mxu0 %vm322_vm0, %v799_v12 }
  0xf9   : > { %v718_v21 = vpop.f32.mrf.mxu0 }
  0xfb   : > { %v381_v22 = vpop.f32.mrf.mxu0 }
  0xfd   : > { %v719_v23 = vpop.f32.mrf.mxu0 }
  0xfe   : > { %v479_v43 = vpack.c.bf16 %v719_v23, %v718_v21 }
  0xff   : > { %v384_v24 = vpop.f32.mrf.mxu0 }
 0x100   : > { %v478_v44 = vpack.c.bf16 %v384_v24, %v381_v22 }
 0x101   : > { %v722_v25 = vpop.f32.mrf.mxu0 }
 0x103   : > { %v397_v26 = vpop.f32.mrf.mxu0 }
 0x105   : > { %v723_v27 = vpop.f32.mrf.mxu0 }
 0x106   : > { %v481_v41 = vpack.c.bf16 %v723_v27, %v722_v25 }
 0x107   : > { %v400_v28 = vpop.f32.mrf.mxu0 }
 0x108   : > { %v480_v42 = vpack.c.bf16 %v400_v28, %v397_v26 }
 0x109   : > { %v726_v29 = vpop.f32.mrf.mxu0 }
 0x10b   : > { %v413_v30 = vpop.f32.mrf.mxu0 }
 0x10d   : > { %v727_v31 = vpop.f32.mrf.mxu0 }
 0x10e   : > { %v483_v39 = vpack.c.bf16 %v727_v31, %v726_v29 }
 0x10f   : > { %v416_v32 = vpop.f32.mrf.mxu0 }
 0x110   : > { %v482_v40 = vpack.c.bf16 %v416_v32, %v413_v30 }
 0x111   : > { %v730_v33 = vpop.f32.mrf.mxu0 }
 0x113   : > { %v429_v34 = vpop.f32.mrf.mxu0 }
 0x115   : > { %v731_v35 = vpop.f32.mrf.mxu0 }
 0x116   : > { %v485_v36 = vpack.c.bf16 %v731_v35, %v730_v33 }
 0x117   : > { %v432_v37 = vpop.f32.mrf.mxu0 }
 0x118   : > { %v484_v38 = vpack.c.bf16 %v432_v37, %v429_v34  ;;  %732 = vmatprep.subr.bf16.mxu1 %v485_v36 }
 0x119   : > { %733 = vmatpush3.bf16.msra.mxu1 %v485_v36 }
 0x11a   : > { %734 = vmatprep.subr.bf16.mxu1 %v484_v38 }
 0x11d   : > { %735 = vmatpush3.bf16.msra.mxu1 %v484_v38 }
 0x11e   : > { %736 = vmatprep.subr.bf16.mxu1 %v483_v39 }
 0x121   : > { %737 = vmatpush3.bf16.msra.mxu1 %v483_v39 }
 0x122   : > { %738 = vmatprep.subr.bf16.mxu1 %v482_v40 }
 0x125   : > { %739 = vmatpush3.bf16.msra.mxu1 %v482_v40 }
 0x126   : > { %740 = vmatprep.subr.bf16.mxu1 %v481_v41 }
 0x129   : > { %741 = vmatpush3.bf16.msra.mxu1 %v481_v41 }
 0x12a   : > { %742 = vmatprep.subr.bf16.mxu1 %v480_v42 }
 0x12d   : > { %743 = vmatpush3.bf16.msra.mxu1 %v480_v42 }
 0x12e   : > { %744 = vmatprep.subr.bf16.mxu1 %v479_v43 }
 0x131   : > { %745 = vmatpush3.bf16.msra.mxu1 %v479_v43 }
 0x132   : > { %746 = vmatprep.subr.bf16.mxu1 %v478_v44 }
 0x135   : > { %747 = vmatpush3.bf16.msra.mxu1 %v478_v44 }
 0x138   : > { %749 = vmatmul.mubr.msk.bf16.vlgmr.msra.gmra.mxu1 %vm961_vm6, %v868_v19 }
 0x1f8   : > { %v750_v46 = vpop.f32.mrf.mxu1 }
 0x1f9   : > { %v537_v48 = vadd.f32 %v750_v46, %v476_v45 }
 0x1fa   : > { %v520_v49 = vpop.f32.mrf.mxu1 }
 0x1fb   : > { %541 = vst [vmem:[#allocation4 + $0x10] sm:$0xff] %v537_v48  ;;  %v535_v51 = vadd.f32 %v520_v49, %v474_v47 }
 0x1fc   : > { %v751_v52 = vpop.f32.mrf.mxu1 }
 0x1fd   : > { %539 = vst [vmem:[#allocation4] sm:$0xff] %v535_v51  ;;  %v538_v54 = vadd.f32 %v751_v52, %v477_v50  ;;  %546 = sbr.rel (%p680_p13) target bundleno = 524 (0x20c), region = 40 }
 0x1fe   : > { %v523_v55 = vpop.f32.mrf.mxu1 }
 0x1ff   : > { %542 = vst [vmem:[#allocation4 + $0x18] sm:$0xff] %v538_v54  ;;  %v536_v56 = vadd.f32 %v523_v55, %v475_v53 }
 0x201   : > { %540 = vst [vmem:[#allocation4 + $0x8] sm:$0xff] %v536_v56 }
 0x202   : > { %v549_v59 = vld [vmem:[#allocation4 + $0x10] sm:$0xff] }
 0x203   : > { %v553_v62 = vmax.f32 %v549_v59, 0.0 }
 0x204   : > { %v547_v57 = vld [vmem:[#allocation4] sm:$0xff] }
 0x205   : > { %v551_v60 = vmax.f32 %v547_v57, 0.0  ;;  %557 = vst [vmem:[#allocation4 + $0x10] sm:$0xff] %v553_v62 }
 0x206   : > { %v550_v63 = vld [vmem:[#allocation4 + $0x18] sm:$0xff] }
 0x207   : > { %v554_v0 = vmax.f32 %v550_v63, 0.0  ;;  %555 = vst [vmem:[#allocation4] sm:$0xff] %v551_v60 }
 0x208   : > { %v548_v58 = vld [vmem:[#allocation4 + $0x8] sm:$0xff] }
 0x209   : > { %v552_v61 = vmax.f32 %v548_v58, 0.0  ;;  %558 = vst [vmem:[#allocation4 + $0x18] sm:$0xff] %v554_v0 }
 0x20b   : > { %556 = vst [vmem:[#allocation4 + $0x8] sm:$0xff] %v552_v61 }
 0x20c PF: > { %p970_p0 = scmp.eq.s32.totalorder %s642_s0, 4  ;;  %s869_s15 = smov [#allocation4]  }
 0x20d   : > { %s568_s16 = sshll.u32 %s869_s15, 4  ;;  %s569_s16 = int_to_ptr.vmem [resolvable:$true] %s568_s16 }
 0x20e   : > { %s812_s17 = scalar_lea.vmem %s569_s16, 512  ;;  %p819_p4 = scmp.lt.s32.totalorder %s569_s16, %s569_s16 }
 0x20f   : > { %p813_p1 = scmp.ne.s32.totalorder %s569_s16, %s812_s17  ;;  %p820_p5 = scmp.lt.s32.totalorder %s812_s17, %s812_s17 }
 0x211   : > { %p814_p2 = pnand %p813_p1, %p970_p0  ;;  %p821_p6 = por %p820_p5, %p819_p4 }
 0x213   : > { %p815_p3 = pneg %p814_p2 }
 0x215   : > { %p822_p7 = pnand %p821_p6, %p815_p3 }
 0x217   : > { %825 = shalt.err (!%p822_p7)
}
 0x218   : > { %s870_s18 = smov 128   ;;  %s871_s19 = smov 8  }
 0x219   : > { %753 = dma.vmem_to_hbm [thread:$0]  (%p970_p0), %s569_s16, 512, %s998_s4, [#allocation5], %s870_s18, %s870_s18, %s871_s19  }
 0x21a   : > { %851 = dma.done.wait (%p970_p0), [#allocation5], 512  }
 0x21b   : > { %853 = vsyncadd (%p970_p0), [#allocation5], 4294966784 }
 0x21c PF: > { %s21_s22 = sadd.s32 1, %s864_s22   ;;  %s1002_s20 = smov %s860_s21 }
 0x21d   : > { %p18_p8 = scmp.ge.s32.totalorder %s21_s22, 7   ;;  %s1003_s21 = smov %s1005_s23 }
 0x21f   :  { %20 = sbr.rel (!%p18_p8) target bundleno = 17 (0x11), region = 74 }
 0x224   :  { %584 = vsyncpa [#allocation5], 1 }
 0x225   :  { %586 = vsyncpa [#allocation5 + $0x1], 1 }

</bundles_post_ra>
